<compile_context>
chip_gen: v7x
topology: tpu7x:2x2x1
jax: 0.10.0
libtpu: 0.0.40
codegen_flags: <defaults>
</compile_context>

<pallas_src>
import functools

import jax
import jax.numpy as jnp
from jax import lax
from jax.experimental import pallas as pl
from jax.experimental.pallas import tpu as pltpu


def autopad(k, p=None, d=1):
    """Pad to 'same' shape outputs (mirrors ultralytics autopad)."""
    if d > 1:
        k = d * (k - 1) + 1 if isinstance(k, int) else [d * (x - 1) + 1 for x in k]
    if p is None:
        p = k // 2 if isinstance(k, int) else [x // 2 for x in k]
    return p


# ---------------------------------------------------------------------------
# Fused kernel: 1x1 conv (+BN1) -> depthwise kxk conv (+BN2) -> ReLU
# ---------------------------------------------------------------------------
def _lightconv_kernel(x_ref, w1_ref, w2_ref, b2_ref, mask_ref, o_ref, *,
                      k, W, use_mxu):
    # x_ref   : (C1+1, BHW) bf16   (last row is ones -> BN1 shift folded in w1)
    # w1_ref  : (C2, C1+1)  f32    (BN1 scale folded; last col = BN1 shift)
    # w2_ref  : (C2, k*k)   f32    (BN2 scale folded)
    # b2_ref  : (C2, 1)     f32    (BN2 shift)
    # mask_ref: (k*k, BHW)  f32    (precomputed per-image border validity)
    # o_ref   : (C2, BHW)
    w1 = w1_ref[...]

    # ---- conv1: 1x1 pointwise conv, bias folded into the contraction -------
    if use_mxu:
        y1 = jnp.dot(w1.astype(jnp.bfloat16), x_ref[...],
                     preferred_element_type=jnp.float32)
    else:
        # Tiny channels: (C1+1) VPU FMA passes beat MXU fill/drain.
        x = x_ref[...].astype(jnp.float32)
        c1p1 = w1.shape[1]
        y1 = w1[:, 0:1] * x[0:1, :]
        for c in range(1, c1p1):
            y1 = y1 + w1[:, c:c + 1] * x[c:c + 1, :]

    # ---- conv2: depthwise kxk via lane rolls (XLU) + pre-masked weights ----
    w2 = w2_ref[...]
    mask = mask_ref[...]
    bhw = y1.shape[1]
    pad = k // 2
    acc = jnp.zeros_like(y1)
    for i in range(k):
        di = i - pad
        for j in range(k):
            dj = j - pad
            off = di * W + dj
            tap = i * k + j
            # shifted[p] == y1[p + off]; wrap / cross-image / out-of-image taps
            # are zeroed by the precomputed mask.
            shifted = pltpu.roll(y1, shift=(-off) % bhw, axis=1) if off else y1
            acc = acc + (w2[:, tap:tap + 1] * mask[tap:tap + 1, :]) * shifted

    y2 = acc + b2_ref[...]
    o_ref[...] = jnp.maximum(y2, 0.0).astype(o_ref.dtype)


# ---------------------------------------------------------------------------
# Wrapper: fold BNs, build lane-dense layout + masks, call the kernel.
# ---------------------------------------------------------------------------
@functools.partial(jax.jit, static_argnames=("k", "eps", "out_dtype"))
def lightconv_forward(x, w1, g1, b1, m1, v1, w2, g2, b2, m2, v2, *, k,
                      eps=1e-5, out_dtype=jnp.float32):
    """x: [N, C1, H, W] (NCHW). Returns [N, C2, H, W] in `out_dtype`."""
    N, C1, H, W = x.shape
    C2 = w1.shape[0]
    pad = autopad(k, None, 1)
    HW = H * W
    HW_pad = ((HW + 127) // 128) * 128          # lane-dense spatial plane

    # Images per grid step: target a big lane slab to amortize step overhead.
    LANE_TARGET = 4096
    NB = max(1, min(N, LANE_TARGET // HW_pad))
    n_blocks = -(-N // NB)
    N_pad = n_blocks * NB
    BHW = NB * HW_pad

    # ---- fold BatchNorms (inference) into weights + per-channel shifts -----
    s1 = g1 / jnp.sqrt(v1 + eps)
    w1_mat = w1.reshape(C2, C1) * s1[:, None]
    b1_vec = b1 - m1 * s1
    # bias as an extra contraction column (paired with a ones row in x)
    w1_aug = jnp.concatenate([w1_mat, b1_vec[:, None]], axis=1).astype(jnp.float32)

    s2 = g2 / jnp.sqrt(v2 + eps)
    w2_mat = (w2.reshape(C2, k * k) * s2[:, None]).astype(jnp.float32)
    b2_vec = (b2 - m2 * s2).reshape(C2, 1).astype(jnp.float32)

    # ---- channel-major, batch folded into lanes: (C1+1, N_pad*HW_pad) ------
    x_flat = x.reshape(N, C1, HW)
    x_flat = jnp.pad(x_flat, ((0, N_pad - N), (0, 0), (0, HW_pad - HW)))
    x_cm = x_flat.transpose(1, 0, 2).reshape(C1, N_pad * HW_pad)
    ones = jnp.ones((1, N_pad * HW_pad), x_cm.dtype)
    x_aug = jnp.concatenate([x_cm, ones], axis=0).astype(jnp.bfloat16)

    # ---- precomputed border masks (hoisted out of the kernel tap loop) -----
    idx = jnp.arange(HW_pad, dtype=jnp.int32)
    row = idx // W
    col = idx % W
    in_img = idx < HW
    masks = []
    for i in range(k):
        di = i - pad
        for j in range(k):
            dj = j - pad
            masks.append(in_img & (row + di >= 0) & (row + di < H)
                         & (col + dj >= 0) & (col + dj < W))
    mask = jnp.stack(masks).astype(jnp.float32)          # (k*k, HW_pad)
    mask = jnp.tile(mask, (1, NB))                       # (k*k, NB*HW_pad)

    # MXU only when the contraction / output channels are big enough to feed it.
    use_mxu = (C1 + 1) >= 16 or C2 >= 128

    # VMEM cap per chip: <=48 MiB on v7x (64 MiB physical), up to 96 MiB else.
    try:
        vmem_cap = pltpu.get_tpu_info().vmem_capacity_bytes
        vmem_limit = int(min(96 * 1024 * 1024, (vmem_cap * 3) // 4))
    except Exception:
        vmem_limit = 48 * 1024 * 1024

    kern = functools.partial(_lightconv_kernel, k=k, W=W, use_mxu=use_mxu)
    out = pl.pallas_call(
        kern,
        out_shape=jax.ShapeDtypeStruct((C2, N_pad * HW_pad), out_dtype),
        grid_spec=pltpu.PrefetchScalarGridSpec(
            num_scalar_prefetch=0,
            grid=(n_blocks,),
            in_specs=[
                pl.BlockSpec((C1 + 1, BHW), lambda n: (0, n)),   # x (per batch block)
                pl.BlockSpec((C2, C1 + 1), lambda n: (0, 0)),    # folded 1x1 weight+bias
                pl.BlockSpec((C2, k * k), lambda n: (0, 0)),     # folded DW weight
                pl.BlockSpec((C2, 1), lambda n: (0, 0)),         # BN2 shift
                pl.BlockSpec((k * k, BHW), lambda n: (0, 0)),    # border masks
            ],
            out_specs=pl.BlockSpec((C2, BHW), lambda n: (0, n)),
        ),
        compiler_params=pltpu.CompilerParams(
            dimension_semantics=("parallel",),
            vmem_limit_bytes=vmem_limit,
        ),
    )(x_aug, w1_aug, w2_mat, b2_vec, mask)

    out = out.reshape(C2, N_pad, HW_pad).transpose(1, 0, 2)[:N, :, :HW]
    return out.reshape(N, C2, H, W)


# ---------------------------------------------------------------------------
# Plain-JAX reference (for a sanity check).
# ---------------------------------------------------------------------------
def lightconv_reference(x, w1, g1, b1, m1, v1, w2, g2, b2, m2, v2, *, k, eps=1e-5):
    C2 = w1.shape[0]
    pad = autopad(k, None, 1)
    y = lax.conv_general_dilated(
        x.astype(jnp.float32), w1.astype(jnp.float32),
        window_strides=(1, 1), padding=((0, 0), (0, 0)),
        dimension_numbers=("NCHW", "OIHW", "NCHW"))
    s1 = (g1 / jnp.sqrt(v1 + eps)).reshape(1, -1, 1, 1)
    y = y * s1 + (b1.reshape(1, -1, 1, 1) - m1.reshape(1, -1, 1, 1) * s1)
    y2 = lax.conv_general_dilated(
        y, w2.astype(jnp.float32),
        window_strides=(1, 1), padding=((pad, pad), (pad, pad)),
        feature_group_count=C2,
        dimension_numbers=("NCHW", "OIHW", "NCHW"))
    s2 = (g2 / jnp.sqrt(v2 + eps)).reshape(1, -1, 1, 1)
    y2 = y2 * s2 + (b2.reshape(1, -1, 1, 1) - m2.reshape(1, -1, 1, 1) * s2)
    return jnp.maximum(y2, 0.0)


if __name__ == "__main__":
    # LightConv(c1=4, c2=8, k=3, act=ReLU)
    c1, c2, k = 4, 8, 3

    key = jax.random.PRNGKey(0)
    kx, kw1, kw2 = jax.random.split(key, 3)

    x = jax.random.normal(kx, (2, c1, 16, 16), dtype=jnp.float32)            # NCHW
    w1 = jax.random.normal(kw1, (c2, c1, 1, 1), dtype=jnp.float32) * 0.1     # 1x1 conv
    w2 = jax.random.normal(kw2, (c2, 1, k, k), dtype=jnp.float32) * 0.1      # depthwise

    # Deterministic (non-trivial) BatchNorm2d parameters, inference semantics.
    ar = jnp.arange(c2, dtype=jnp.float32)
    g1, b1, m1, v1 = 1.0 + 0.10 * ar, 0.05 * ar, 0.01 * ar, 1.0 + 0.02 * ar
    g2, b2, m2, v2 = 1.0 - 0.05 * ar, -0.03 * ar, 0.02 * ar, 1.0 + 0.03 * ar

    out = lightconv_forward(x, w1, g1, b1, m1, v1, w2, g2, b2, m2, v2, k=k)
    out = jax.block_until_ready(out)

    ref = lightconv_reference(x, w1, g1, b1, m1, v1, w2, g2, b2, m2, v2, k=k)
    assert out.shape == (2, c2, 16, 16), out.shape
    # Tolerance reflects bf16 quantization of the streamed input (all other
    # math is f32).
    err = float(jnp.max(jnp.abs(out - ref)))
    assert jnp.allclose(out, ref, atol=3e-2, rtol=3e-2), err

    print("KERNEL_OK")
</pallas_src>

<mosaic_0001>
module attributes {stable_mosaic.version = 11 : i64} {
  func.func @_lightconv_kernel(%arg0: i32, %arg1: memref<5x512xbf16, #tpu.memory_space<vmem>>, %arg2: memref<8x5xf32, #tpu.memory_space<vmem>>, %arg3: memref<8x9xf32, #tpu.memory_space<vmem>>, %arg4: memref<8x1xf32, #tpu.memory_space<vmem>>, %arg5: memref<9x512xf32, #tpu.memory_space<vmem>>, %arg6: memref<8x512xf32, #tpu.memory_space<vmem>>) attributes {dimension_semantics = [#tpu.dimension_semantics<parallel>], iteration_bounds = array<i64: 1>, scalar_prefetch = 0 : i64, scratch_operands = 0 : i64, tpu.core_type = #tpu.core_type<tc>, window_params = [{transform_indices = @transform_0, window_bounds = array<i64: 5, 512>}, {pipeline_mode = #tpu.pipeline_mode<synchronous>, transform_indices = @transform_1, window_bounds = array<i64: 8, 5>}, {pipeline_mode = #tpu.pipeline_mode<synchronous>, transform_indices = @transform_2, window_bounds = array<i64: 8, 9>}, {pipeline_mode = #tpu.pipeline_mode<synchronous>, transform_indices = @transform_3, window_bounds = array<i64: 8, 1>}, {pipeline_mode = #tpu.pipeline_mode<synchronous>, transform_indices = @transform_4, window_bounds = array<i64: 9, 512>}, {transform_indices = @transform_5, window_bounds = array<i64: 8, 512>}]} {
    %c0 = arith.constant 0 : index
    %c0_0 = arith.constant 0 : index
    %0 = vector.load %arg2[%c0, %c0_0] : memref<8x5xf32, #tpu.memory_space<vmem>>, vector<8x5xf32>
    %c0_1 = arith.constant 0 : index
    %c0_2 = arith.constant 0 : index
    %1 = vector.load %arg1[%c0_1, %c0_2] : memref<5x512xbf16, #tpu.memory_space<vmem>>, vector<5x512xbf16>
    %2 = arith.extf %1 : vector<5x512xbf16> to vector<5x512xf32>
    %3 = vector.extract_strided_slice %0 {offsets = [0, 0], sizes = [8, 1], strides = [1, 1]} : vector<8x5xf32> to vector<8x1xf32>
    %4 = vector.extract_strided_slice %2 {offsets = [0, 0], sizes = [1, 512], strides = [1, 1]} : vector<5x512xf32> to vector<1x512xf32>
    %5 = vector.broadcast %3 : vector<8x1xf32> to vector<8x512xf32>
    %6 = vector.broadcast %4 : vector<1x512xf32> to vector<8x512xf32>
    %7 = arith.mulf %5, %6 : vector<8x512xf32>
    %8 = vector.extract_strided_slice %0 {offsets = [0, 1], sizes = [8, 1], strides = [1, 1]} : vector<8x5xf32> to vector<8x1xf32>
    %9 = vector.extract_strided_slice %2 {offsets = [1, 0], sizes = [1, 512], strides = [1, 1]} : vector<5x512xf32> to vector<1x512xf32>
    %10 = vector.broadcast %8 : vector<8x1xf32> to vector<8x512xf32>
    %11 = vector.broadcast %9 : vector<1x512xf32> to vector<8x512xf32>
    %12 = arith.mulf %10, %11 : vector<8x512xf32>
    %13 = arith.addf %7, %12 : vector<8x512xf32>
    %14 = vector.extract_strided_slice %0 {offsets = [0, 2], sizes = [8, 1], strides = [1, 1]} : vector<8x5xf32> to vector<8x1xf32>
    %15 = vector.extract_strided_slice %2 {offsets = [2, 0], sizes = [1, 512], strides = [1, 1]} : vector<5x512xf32> to vector<1x512xf32>
    %16 = vector.broadcast %14 : vector<8x1xf32> to vector<8x512xf32>
    %17 = vector.broadcast %15 : vector<1x512xf32> to vector<8x512xf32>
    %18 = arith.mulf %16, %17 : vector<8x512xf32>
    %19 = arith.addf %13, %18 : vector<8x512xf32>
    %20 = vector.extract_strided_slice %0 {offsets = [0, 3], sizes = [8, 1], strides = [1, 1]} : vector<8x5xf32> to vector<8x1xf32>
    %21 = vector.extract_strided_slice %2 {offsets = [3, 0], sizes = [1, 512], strides = [1, 1]} : vector<5x512xf32> to vector<1x512xf32>
    %22 = vector.broadcast %20 : vector<8x1xf32> to vector<8x512xf32>
    %23 = vector.broadcast %21 : vector<1x512xf32> to vector<8x512xf32>
    %24 = arith.mulf %22, %23 : vector<8x512xf32>
    %25 = arith.addf %19, %24 : vector<8x512xf32>
    %26 = vector.extract_strided_slice %0 {offsets = [0, 4], sizes = [8, 1], strides = [1, 1]} : vector<8x5xf32> to vector<8x1xf32>
    %27 = vector.extract_strided_slice %2 {offsets = [4, 0], sizes = [1, 512], strides = [1, 1]} : vector<5x512xf32> to vector<1x512xf32>
    %28 = vector.broadcast %26 : vector<8x1xf32> to vector<8x512xf32>
    %29 = vector.broadcast %27 : vector<1x512xf32> to vector<8x512xf32>
    %30 = arith.mulf %28, %29 : vector<8x512xf32>
    %31 = arith.addf %25, %30 : vector<8x512xf32>
    %c0_3 = arith.constant 0 : index
    %c0_4 = arith.constant 0 : index
    %32 = vector.load %arg3[%c0_3, %c0_4] : memref<8x9xf32, #tpu.memory_space<vmem>>, vector<8x9xf32>
    %c0_5 = arith.constant 0 : index
    %c0_6 = arith.constant 0 : index
    %33 = vector.load %arg5[%c0_5, %c0_6] : memref<9x512xf32, #tpu.memory_space<vmem>>, vector<9x512xf32>
    %cst = arith.constant 0.000000e+00 : f32
    %34 = vector.broadcast %cst : f32 to vector<8x512xf32>
    %c17_i32 = arith.constant 17 : i32
    %35 = tpu.dynamic_rotate %31 by %c17_i32 dim 1 : vector<8x512xf32>, i32 -> vector<8x512xf32>
    %36 = vector.extract_strided_slice %32 {offsets = [0, 0], sizes = [8, 1], strides = [1, 1]} : vector<8x9xf32> to vector<8x1xf32>
    %37 = vector.extract_strided_slice %33 {offsets = [0, 0], sizes = [1, 512], strides = [1, 1]} : vector<9x512xf32> to vector<1x512xf32>
    %38 = vector.broadcast %36 : vector<8x1xf32> to vector<8x512xf32>
    %39 = vector.broadcast %37 : vector<1x512xf32> to vector<8x512xf32>
    %40 = arith.mulf %38, %39 : vector<8x512xf32>
    %41 = arith.mulf %40, %35 : vector<8x512xf32>
    %42 = arith.addf %34, %41 : vector<8x512xf32>
    %c16_i32 = arith.constant 16 : i32
    %43 = tpu.dynamic_rotate %31 by %c16_i32 dim 1 : vector<8x512xf32>, i32 -> vector<8x512xf32>
    %44 = vector.extract_strided_slice %32 {offsets = [0, 1], sizes = [8, 1], strides = [1, 1]} : vector<8x9xf32> to vector<8x1xf32>
    %45 = vector.extract_strided_slice %33 {offsets = [1, 0], sizes = [1, 512], strides = [1, 1]} : vector<9x512xf32> to vector<1x512xf32>
    %46 = vector.broadcast %44 : vector<8x1xf32> to vector<8x512xf32>
    %47 = vector.broadcast %45 : vector<1x512xf32> to vector<8x512xf32>
    %48 = arith.mulf %46, %47 : vector<8x512xf32>
    %49 = arith.mulf %48, %43 : vector<8x512xf32>
    %50 = arith.addf %42, %49 : vector<8x512xf32>
    %c15_i32 = arith.constant 15 : i32
    %51 = tpu.dynamic_rotate %31 by %c15_i32 dim 1 : vector<8x512xf32>, i32 -> vector<8x512xf32>
    %52 = vector.extract_strided_slice %32 {offsets = [0, 2], sizes = [8, 1], strides = [1, 1]} : vector<8x9xf32> to vector<8x1xf32>
    %53 = vector.extract_strided_slice %33 {offsets = [2, 0], sizes = [1, 512], strides = [1, 1]} : vector<9x512xf32> to vector<1x512xf32>
    %54 = vector.broadcast %52 : vector<8x1xf32> to vector<8x512xf32>
    %55 = vector.broadcast %53 : vector<1x512xf32> to vector<8x512xf32>
    %56 = arith.mulf %54, %55 : vector<8x512xf32>
    %57 = arith.mulf %56, %51 : vector<8x512xf32>
    %58 = arith.addf %50, %57 : vector<8x512xf32>
    %c1_i32 = arith.constant 1 : i32
    %59 = tpu.dynamic_rotate %31 by %c1_i32 dim 1 : vector<8x512xf32>, i32 -> vector<8x512xf32>
    %60 = vector.extract_strided_slice %32 {offsets = [0, 3], sizes = [8, 1], strides = [1, 1]} : vector<8x9xf32> to vector<8x1xf32>
    %61 = vector.extract_strided_slice %33 {offsets = [3, 0], sizes = [1, 512], strides = [1, 1]} : vector<9x512xf32> to vector<1x512xf32>
    %62 = vector.broadcast %60 : vector<8x1xf32> to vector<8x512xf32>
    %63 = vector.broadcast %61 : vector<1x512xf32> to vector<8x512xf32>
    %64 = arith.mulf %62, %63 : vector<8x512xf32>
    %65 = arith.mulf %64, %59 : vector<8x512xf32>
    %66 = arith.addf %58, %65 : vector<8x512xf32>
    %67 = vector.extract_strided_slice %32 {offsets = [0, 4], sizes = [8, 1], strides = [1, 1]} : vector<8x9xf32> to vector<8x1xf32>
    %68 = vector.extract_strided_slice %33 {offsets = [4, 0], sizes = [1, 512], strides = [1, 1]} : vector<9x512xf32> to vector<1x512xf32>
    %69 = vector.broadcast %67 : vector<8x1xf32> to vector<8x512xf32>
    %70 = vector.broadcast %68 : vector<1x512xf32> to vector<8x512xf32>
    %71 = arith.mulf %69, %70 : vector<8x512xf32>
    %72 = arith.mulf %71, %31 : vector<8x512xf32>
    %73 = arith.addf %66, %72 : vector<8x512xf32>
    %c511_i32 = arith.constant 511 : i32
    %74 = tpu.dynamic_rotate %31 by %c511_i32 dim 1 : vector<8x512xf32>, i32 -> vector<8x512xf32>
    %75 = vector.extract_strided_slice %32 {offsets = [0, 5], sizes = [8, 1], strides = [1, 1]} : vector<8x9xf32> to vector<8x1xf32>
    %76 = vector.extract_strided_slice %33 {offsets = [5, 0], sizes = [1, 512], strides = [1, 1]} : vector<9x512xf32> to vector<1x512xf32>
    %77 = vector.broadcast %75 : vector<8x1xf32> to vector<8x512xf32>
    %78 = vector.broadcast %76 : vector<1x512xf32> to vector<8x512xf32>
    %79 = arith.mulf %77, %78 : vector<8x512xf32>
    %80 = arith.mulf %79, %74 : vector<8x512xf32>
    %81 = arith.addf %73, %80 : vector<8x512xf32>
    %c497_i32 = arith.constant 497 : i32
    %82 = tpu.dynamic_rotate %31 by %c497_i32 dim 1 : vector<8x512xf32>, i32 -> vector<8x512xf32>
    %83 = vector.extract_strided_slice %32 {offsets = [0, 6], sizes = [8, 1], strides = [1, 1]} : vector<8x9xf32> to vector<8x1xf32>
    %84 = vector.extract_strided_slice %33 {offsets = [6, 0], sizes = [1, 512], strides = [1, 1]} : vector<9x512xf32> to vector<1x512xf32>
    %85 = vector.broadcast %83 : vector<8x1xf32> to vector<8x512xf32>
    %86 = vector.broadcast %84 : vector<1x512xf32> to vector<8x512xf32>
    %87 = arith.mulf %85, %86 : vector<8x512xf32>
    %88 = arith.mulf %87, %82 : vector<8x512xf32>
    %89 = arith.addf %81, %88 : vector<8x512xf32>
    %c496_i32 = arith.constant 496 : i32
    %90 = tpu.dynamic_rotate %31 by %c496_i32 dim 1 : vector<8x512xf32>, i32 -> vector<8x512xf32>
    %91 = vector.extract_strided_slice %32 {offsets = [0, 7], sizes = [8, 1], strides = [1, 1]} : vector<8x9xf32> to vector<8x1xf32>
    %92 = vector.extract_strided_slice %33 {offsets = [7, 0], sizes = [1, 512], strides = [1, 1]} : vector<9x512xf32> to vector<1x512xf32>
    %93 = vector.broadcast %91 : vector<8x1xf32> to vector<8x512xf32>
    %94 = vector.broadcast %92 : vector<1x512xf32> to vector<8x512xf32>
    %95 = arith.mulf %93, %94 : vector<8x512xf32>
    %96 = arith.mulf %95, %90 : vector<8x512xf32>
    %97 = arith.addf %89, %96 : vector<8x512xf32>
    %c495_i32 = arith.constant 495 : i32
    %98 = tpu.dynamic_rotate %31 by %c495_i32 dim 1 : vector<8x512xf32>, i32 -> vector<8x512xf32>
    %99 = vector.extract_strided_slice %32 {offsets = [0, 8], sizes = [8, 1], strides = [1, 1]} : vector<8x9xf32> to vector<8x1xf32>
    %100 = vector.extract_strided_slice %33 {offsets = [8, 0], sizes = [1, 512], strides = [1, 1]} : vector<9x512xf32> to vector<1x512xf32>
    %101 = vector.broadcast %99 : vector<8x1xf32> to vector<8x512xf32>
    %102 = vector.broadcast %100 : vector<1x512xf32> to vector<8x512xf32>
    %103 = arith.mulf %101, %102 : vector<8x512xf32>
    %104 = arith.mulf %103, %98 : vector<8x512xf32>
    %105 = arith.addf %97, %104 : vector<8x512xf32>
    %c0_7 = arith.constant 0 : index
    %c0_8 = arith.constant 0 : index
    %106 = vector.load %arg4[%c0_7, %c0_8] : memref<8x1xf32, #tpu.memory_space<vmem>>, vector<8x1xf32>
    %107 = vector.broadcast %106 : vector<8x1xf32> to vector<8x512xf32>
    %108 = arith.addf %105, %107 : vector<8x512xf32>
    %cst_9 = arith.constant 0.000000e+00 : f32
    %109 = vector.broadcast %cst_9 : f32 to vector<8x512xf32>
    %110 = arith.maximumf %108, %109 : vector<8x512xf32>
    %c0_10 = arith.constant 0 : index
    %c0_11 = arith.constant 0 : index
    %111 = vector.load %arg6[%c0_10, %c0_11] : memref<8x512xf32, #tpu.memory_space<vmem>>, vector<8x512xf32>
    tpu.vector_store %arg6[%c0_10, %c0_11], %110 {strides = array<i32>} : memref<8x512xf32, #tpu.memory_space<vmem>>, vector<8x512xf32>,
    return
  }
  func.func @transform_0(%arg0: i32) -> (i32, i32) {
    %c0_i32 = arith.constant 0 : i32
    %c0_i32_0 = arith.constant 0 : i32
    return %c0_i32, %arg0 : i32, i32
  }
  func.func @transform_1(%arg0: i32) -> (i32, i32) {
    %c0_i32 = arith.constant 0 : i32
    %c0_i32_0 = arith.constant 0 : i32
    %c0_i32_1 = arith.constant 0 : i32
    return %c0_i32, %c0_i32_0 : i32, i32
  }
  func.func @transform_2(%arg0: i32) -> (i32, i32) {
    %c0_i32 = arith.constant 0 : i32
    %c0_i32_0 = arith.constant 0 : i32
    %c0_i32_1 = arith.constant 0 : i32
    return %c0_i32, %c0_i32_0 : i32, i32
  }
  func.func @transform_3(%arg0: i32) -> (i32, i32) {
    %c0_i32 = arith.constant 0 : i32
    %c0_i32_0 = arith.constant 0 : i32
    %c0_i32_1 = arith.constant 0 : i32
    return %c0_i32, %c0_i32_0 : i32, i32
  }
  func.func @transform_4(%arg0: i32) -> (i32, i32) {
    %c0_i32 = arith.constant 0 : i32
    %c0_i32_0 = arith.constant 0 : i32
    %c0_i32_1 = arith.constant 0 : i32
    return %c0_i32, %c0_i32_0 : i32, i32
  }
  func.func @transform_5(%arg0: i32) -> (i32, i32) {
    %c0_i32 = arith.constant 0 : i32
    %c0_i32_0 = arith.constant 0 : i32
    return %c0_i32, %arg0 : i32, i32
  }
}

</mosaic_0001>

<bundles_post_ra>
// kernel: lightconv_forward.1
= control target key start
LH: loop header
LB: loop body
LE: loop exit
PB: predicated region body
PF: predicated region fallthrough
CT: control target
= control target key end

     0   :  { %v626_v0 = vmov 1   ;;  %v627_v1 = vmov 2   ;;  %v628_v3 = vmov 0   ;;  %v629_v4 = vmov 3   ;;  %s635_s28 = smov 17   ;;  %s636_s29 = smov 16   ;;  %s1026_s1 = inlined_call_operand.vmem [shape: f32[8,5], index: 1, kind: input, shape index: {}]   ;;  %s1027_s2 = inlined_call_operand.vmem [shape: f32[8,9], index: 2, kind: input, shape index: {}]   ;;  %s1028_s3 = inlined_call_operand.vmem [shape: f32[8,1], index: 3, kind: input, shape index: {}]   ;;  %s1029_s0 = inlined_call_operand.vmem [shape: bf16[5,512], index: 0, kind: input, shape index: {}]   ;;  %s1030_s4 = inlined_call_operand.vmem [shape: f32[9,512], index: 4, kind: input, shape index: {}]   ;;  %s1031_s5 = inlined_call_operand.vmem [shape: f32[8,512], index: 5, kind: output, shape index: {}]  }
   0x1   :  { %611 = vset.pattern.permute.xlu0 %v626_v0  ;;  %613 = vset.pattern.permute.xlu1 %v627_v1  ;;  %v20_v2 = vld [vmem:[%s1026_s1] sm:$0xff]  ;;  %v630_v6 = vmov 4   ;;  %v631_v7 = vmov 5   ;;  %v632_v8 = vmov 8   ;;  %v633_v10 = vmov 6   ;;  %s637_s30 = smov 15  }
   0x2   :  { %53 = vperm.xlu0 %611, %v20_v2   ;;  %81 = vperm.xlu1 %613, %v20_v2   ;;  %v164_v5 = vld [vmem:[%s1027_s2] sm:$0xff]  ;;  %v634_v11 = vmov 7   ;;  %v32_v12 = vlaneseq  ;;  %v22_v15 = vld [vmem:[%s1029_s0 + $0x8] sm:$0x77]  ;;  %s638_s6 = smov 1   ;;  %s639_s7 = smov 127  }
   0x3   :  { %v568_v9 = vld [vmem:[%s1028_s3] sm:$0xff]  ;;  %v694_v19 = vunpack.c.l.bf16 %v22_v15  ;;  %v26_v20 = vunpack.c.h.bf16 %v22_v15  ;;  %s640_s8 = smov 113   ;;  %s641_s9 = smov 112  }
   0x4   :  { %v683_v13 = vshrl.u32 %v32_v12, 7  ;;  %v21_v14 = vld [vmem:[%s1029_s0] sm:$0x77]  ;;  %s642_s10 = smov 111  }
   0x5   :  { %v23_v16 = vunpack.c.l.bf16 %v21_v14  ;;  %v24_v18 = vunpack.c.h.bf16 %v21_v14 }
   0x6   :  { %612 = vset.pattern.permute.xlu0 %v628_v3  ;;  %614 = vset.pattern.permute.xlu1 %v629_v4  ;;  %v692_v17 = vsub.s32 1, %v683_v13  ;;  %v697_v21 = vsub.s32 0, %v683_v13  ;;  %v700_v22 = vsub.s32 2, %v683_v13  ;;  %v703_v25 = vsub.s32 3, %v683_v13 }
   0x7   :  { %29 = vperm.xlu0 %612, %v20_v2   ;;  %109 = vperm.xlu1 %614, %v20_v2   ;;  %v706_v26 = vsub.s32 4, %v683_v13 }
   0x8   :  { %v59_v27 = vrot.slane %v23_v16, %v692_v17  ;;  %v63_v28 = vrot.slane %v24_v18, %v692_v17  ;;  %v67_v29 = vrot.slane %v694_v19, %v692_v17  ;;  %v71_v30 = vrot.slane %v26_v20, %v692_v17 }
   0x9   :  { %v35_v31 = vrot.slane %v23_v16, %v697_v21  ;;  %v39_v32 = vrot.slane %v24_v18, %v697_v21  ;;  %v43_v33 = vrot.slane %v694_v19, %v697_v21  ;;  %v47_v34 = vrot.slane %v26_v20, %v697_v21 }
   0xa   :  { %v87_v35 = vrot.slane %v23_v16, %v700_v22  ;;  %v91_v36 = vrot.slane %v24_v18, %v700_v22  ;;  %v95_v37 = vrot.slane %v694_v19, %v700_v22  ;;  %v99_v38 = vrot.slane %v26_v20, %v700_v22 }
   0xb   :  { %190 = vperm.xlu0 %612, %v164_v5   ;;  %615 = vset.pattern.permute.xlu1 %v630_v6  ;;  %v115_v39 = vrot.slane %v23_v16, %v703_v25  ;;  %v119_v40 = vrot.slane %v24_v18, %v703_v25  ;;  %v127_v41 = vrot.slane %v26_v20, %v703_v25 }
   0xc   :  { %137 = vperm.xlu1 %615, %v20_v2   ;;  %v143_v42 = vrot.slane %v23_v16, %v706_v26  ;;  %v147_v56 = vrot.slane %v24_v18, %v706_v26  ;;  %v123_v62 = vrot.slane %v694_v19, %v703_v25 }
   0xf   :  { %616 = vset.pattern.permute.xlu0 %v626_v0  ;;  %v155_v0 = vrot.slane %v26_v20, %v706_v26 }
  0x10   :  { %235 = vperm.xlu0 %616, %v164_v5   ;;  %617 = vset.pattern.permute.xlu1 %v627_v1 }
  0x11   :  { %280 = vperm.xlu1 %617, %v164_v5  }
  0x14   :  { %619 = vset.pattern.permute.xlu0 %v630_v6 }
  0x15   :  { %357 = vperm.xlu0 %619, %v164_v5   ;;  %618 = vset.pattern.permute.xlu1 %v629_v4 }
  0x16   :  { %325 = vperm.xlu1 %618, %v164_v5  }
  0x19   :  { %620 = vset.pattern.permute.xlu0 %v631_v7 }
  0x1a   :  { %402 = vperm.xlu0 %620, %v164_v5   ;;  %623 = vset.pattern.permute.xlu1 %v632_v8  ;;  %v151_v8 = vrot.slane %v694_v19, %v706_v26  ;;  %v747_v19 = vld [vmem:[%s1030_s4 + $0x10] sm:$0xff] }
  0x1b   :  { %537 = vperm.xlu1 %623, %v164_v5  }
  0x1e   :  { %621 = vset.pattern.permute.xlu0 %v633_v10 }
  0x1f   :  { %447 = vperm.xlu0 %621, %v164_v5   ;;  %624 = vset.pattern.permute.xlu1 %v628_v3 }
  0x20   :  { %571 = vperm.xlu1 %624, %v568_v9  }
  0x23   :  { %622 = vset.pattern.permute.xlu0 %v634_v11 }
  0x24   :  { %492 = vperm.xlu0 %622, %v164_v5  }
  0x28   :  { %625 = vset.pattern.permute.xlu0 %v628_v3 }
  0x81   :  { %v54_v23 = vpop.permute.xlu0 %53  ;;  %v82_v24 = vpop.permute.xlu1 %81 }
  0x82   :  { %v72_v43 = vmul.f32 %v59_v27, %v54_v23  ;;  %v73_v44 = vmul.f32 %v63_v28, %v54_v23  ;;  %v74_v45 = vmul.f32 %v67_v29, %v54_v23  ;;  %v75_v46 = vmul.f32 %v71_v30, %v54_v23  ;;  %v742_v30 = vld [vmem:[%s1030_s4] sm:$0xff] }
  0x83   :  { %v100_v53 = vmul.f32 %v87_v35, %v82_v24  ;;  %v101_v54 = vmul.f32 %v91_v36, %v82_v24  ;;  %v103_v55 = vmul.f32 %v99_v38, %v82_v24  ;;  %v102_v61 = vmul.f32 %v95_v37, %v82_v24 }
  0x86   :  { %v30_v47 = vpop.permute.xlu0 %29  ;;  %v110_v48 = vpop.permute.xlu1 %109 }
  0x87   :  { %v48_v49 = vmul.f32 %v35_v31, %v30_v47  ;;  %v49_v50 = vmul.f32 %v39_v32, %v30_v47  ;;  %v50_v51 = vmul.f32 %v43_v33, %v30_v47  ;;  %v51_v52 = vmul.f32 %v47_v34, %v30_v47 }
  0x88   :  { %v128_v63 = vmul.f32 %v115_v39, %v110_v48  ;;  %v129_v4 = vmul.f32 %v119_v40, %v110_v48  ;;  %v131_v11 = vmul.f32 %v127_v41, %v110_v48  ;;  %v130_v16 = vmul.f32 %v123_v62, %v110_v48 }
  0x89   :  { %v76_v57 = vadd.f32 %v72_v43, %v48_v49  ;;  %v77_v58 = vadd.f32 %v73_v44, %v49_v50  ;;  %v78_v59 = vadd.f32 %v74_v45, %v50_v51  ;;  %v79_v60 = vadd.f32 %v75_v46, %v51_v52 }
  0x8a   :  { %v731_v5 = vpop.permute.xlu0 %190  ;;  %v363_v31 = vrot.slane %v742_v30, %v706_v26  ;;  %v371_v32 = vrot.slane %v747_v19, %v706_v26  ;;  %v204_v62 = vrot.slane %v747_v19, %v697_v21 }
  0x8b   :  { %v104_v1 = vadd.f32 %v100_v53, %v76_v57  ;;  %v105_v2 = vadd.f32 %v101_v54, %v77_v58  ;;  %v107_v3 = vadd.f32 %v103_v55, %v79_v60  ;;  %v138_v6 = vpop.permute.xlu1 %137  ;;  %v106_v7 = vadd.f32 %v102_v61, %v78_v59  ;;  %v796_v53 = vld [vmem:[%s1030_s4 + $0x8] sm:$0xff] }
  0x8c   :  { %v156_v9 = vmul.f32 %v143_v42, %v138_v6  ;;  %v157_v10 = vmul.f32 %v147_v56, %v138_v6  ;;  %v159_v23 = vmul.f32 %v155_v0, %v138_v6  ;;  %v158_v29 = vmul.f32 %v151_v8, %v138_v6  ;;  %v804_v56 = vld [vmem:[%s1030_s4 + $0x18] sm:$0xff] }
  0x8d   :  { %v132_v14 = vadd.f32 %v128_v63, %v104_v1  ;;  %v133_v15 = vadd.f32 %v129_v4, %v105_v2  ;;  %v135_v18 = vadd.f32 %v131_v11, %v107_v3  ;;  %v134_v28 = vadd.f32 %v130_v16, %v106_v7 }
  0x8e   :  { %v799_v55 = vand.u32 127, %v32_v12  ;;  %v200_v58 = vrot.slane %v796_v53, %v697_v21  ;;  %v245_v59 = vrot.slane %v796_v53, %v692_v17  ;;  %v249_v60 = vrot.slane %v747_v19, %v692_v17 }
  0x8f   :  { %v160_v20 = vadd.f32 %v156_v9, %v132_v14  ;;  %v735_v24 = vadd.f32 %v157_v10, %v133_v15  ;;  %v737_v27 = vpop.permute.xlu0 %235  ;;  %v754_v33 = vadd.f32 %v159_v23, %v135_v18  ;;  %v162_v34 = vadd.f32 %v158_v29, %v134_v28 }
  0x90   :  { %v779_v40 = vpop.permute.xlu1 %280  ;;  %vm229_vm0 = vcmp.lt.s32.totalorder %v799_v55, 16  ;;  %v196_v12 = vrot.slane %v742_v30, %v697_v21  ;;  %vm183_vm1 = vcmp.lt.s32.totalorder %v799_v55, 17  ;;  %v208_v63 = vrot.slane %v804_v56, %v697_v21 }
  0x91   :  { %175 = vrot.lane.b32.xlu1 %v735_v24, %s635_s28  ;;  %173 = vrot.lane.b32.xlu0 %v160_v20, %s635_s28  ;;  %v290_v0 = vrot.slane %v796_v53, %v700_v22  ;;  %v294_v3 = vrot.slane %v747_v19, %v700_v22  ;;  %v286_v4 = vrot.slane %v742_v30, %v700_v22  ;;  %vm274_vm2 = vcmp.lt.s32.totalorder %v799_v55, 15 }
  0x92   :  { %v210_v6 = vmul.f32 %v200_v58, %v731_v5  ;;  %v255_v7 = vmul.f32 %v245_v59, %v737_v27  ;;  %v256_v21 = vmul.f32 %v249_v60, %v737_v27  ;;  %v298_v8 = vrot.slane %v804_v56, %v700_v22 }
  0x93   :  { %v241_v14 = vrot.slane %v742_v30, %v692_v17  ;;  %v253_v15 = vrot.slane %v804_v56, %v692_v17  ;;  %v209_v18 = vmul.f32 %v196_v12, %v731_v5  ;;  %v211_v23 = vmul.f32 %v204_v62, %v731_v5 }
  0x94   :  { %v756_v35 = vpop.permute.xlu0 %357  ;;  %v212_v28 = vmul.f32 %v208_v63, %v731_v5  ;;  %v300_v29 = vmul.f32 %v290_v0, %v779_v40  ;;  %vm319_vm3 = vcmp.lt.s32.totalorder %v799_v55, 1  ;;  %vm396_vm4 = vcmp.lt.s32.totalorder %v799_v55, 127 }
  0x95   :  { %v376_v36 = vmul.f32 %v363_v31, %v756_v35  ;;  %v378_v37 = vmul.f32 %v371_v32, %v756_v35  ;;  %179 = vrot.lane.b32.xlu1 %v754_v33, %s635_s28  ;;  %177 = vrot.lane.b32.xlu0 %v162_v34, %s635_s28  ;;  %v781_v41 = vpop.permute.xlu1 %325  ;;  %v301_v31 = vmul.f32 %v294_v3, %v779_v40  ;;  %vm441_vm5 = vcmp.lt.s32.totalorder %v799_v55, 113 }
  0x96   :  { %vm486_vm6 = vcmp.lt.s32.totalorder %v799_v55, 112  ;;  %vm531_vm7 = vcmp.lt.s32.totalorder %v799_v55, 111 }
  0x97   :  { %v761_v38 = vmul.f32 %v376_v36, %v160_v20  ;;  %v763_v39 = vmul.f32 %v378_v37, %v162_v34 }
  0x99   :  { %221 = vrot.lane.b32.xlu1 %v160_v20, %s636_s29  ;;  %270 = vrot.lane.b32.xlu0 %v162_v34, %s637_s30  ;;  %v783_v42 = vpop.permute.xlu0 %402 }
  0x9a   :  { %v785_v43 = vpop.permute.xlu1 %537 }
  0x9d   :  { %223 = vrot.lane.b32.xlu1 %v735_v24, %s636_s29  ;;  %315 = vrot.lane.b32.xlu0 %v162_v34, %s638_s6 }
  0x9e   :  { %v787_v44 = vpop.permute.xlu0 %447 }
  0x9f   :  { %v789_v45 = vpop.permute.xlu1 %571 }
  0xa1   :  { %225 = vrot.lane.b32.xlu1 %v162_v34, %s636_s29  ;;  %390 = vrot.lane.b32.xlu0 %v735_v24, %s639_s7 }
  0xa3   :  { %v791_v46 = vpop.permute.xlu0 %492 }
  0xa5   :  { %227 = vrot.lane.b32.xlu1 %v754_v33, %s636_s29  ;;  %394 = vrot.lane.b32.xlu0 %v754_v33, %s639_s7 }
  0xa9   :  { %266 = vrot.lane.b32.xlu1 %v160_v20, %s637_s30  ;;  %435 = vrot.lane.b32.xlu0 %v735_v24, %s640_s8 }
  0xad   :  { %268 = vrot.lane.b32.xlu1 %v735_v24, %s637_s30  ;;  %439 = vrot.lane.b32.xlu0 %v754_v33, %s640_s8 }
  0xb1   :  { %272 = vrot.lane.b32.xlu1 %v754_v33, %s637_s30  ;;  %480 = vrot.lane.b32.xlu0 %v735_v24, %s641_s9 }
  0xb5   :  { %311 = vrot.lane.b32.xlu1 %v160_v20, %s638_s6  ;;  %484 = vrot.lane.b32.xlu0 %v754_v33, %s641_s9 }
  0xb9   :  { %313 = vrot.lane.b32.xlu1 %v735_v24, %s638_s6  ;;  %523 = vrot.lane.b32.xlu0 %v160_v20, %s642_s10 }
  0xbd   :  { %317 = vrot.lane.b32.xlu1 %v754_v33, %s638_s6  ;;  %527 = vrot.lane.b32.xlu0 %v162_v34, %s642_s10 }
  0xc1   :  { %388 = vrot.lane.b32.xlu1 %v160_v20, %s639_s7 }
  0xc5   :  { %392 = vrot.lane.b32.xlu1 %v162_v34, %s639_s7 }
  0xc9   :  { %433 = vrot.lane.b32.xlu1 %v160_v20, %s640_s8 }
  0xcd   :  { %437 = vrot.lane.b32.xlu1 %v162_v34, %s640_s8 }
  0xd1   :  { %478 = vrot.lane.b32.xlu1 %v160_v20, %s641_s9 }
  0xd5   :  { %482 = vrot.lane.b32.xlu1 %v162_v34, %s641_s9 }
  0xd9   :  { %525 = vrot.lane.b32.xlu1 %v735_v24, %s642_s10 }
  0xdd   :  { %529 = vrot.lane.b32.xlu1 %v754_v33, %s642_s10 }
 0x103   :  { %v176_v47 = vpop.permute.xlu1 %175  ;;  %v174_v49 = vpop.permute.xlu0 %173 }
 0x104   :  { %v186_v9 = vsel %vm183_vm1, %v174_v49, %v176_v47 }
 0x105   :  { %v214_v32 = vmul.f32 %v210_v6, %v186_v9 }
 0x107   :  { %v180_v48 = vpop.permute.xlu1 %179  ;;  %v178_v51 = vpop.permute.xlu0 %177 }
 0x108   :  { %v185_v10 = vsel %vm183_vm1, %v176_v47, %v178_v51  ;;  %v187_v37 = vsel %vm183_vm1, %v180_v48, %v174_v49  ;;  %v184_v5 = vsel %vm183_vm1, %v178_v51, %v180_v48  ;;  %v254_v47 = vmul.f32 %v241_v14, %v737_v27 }
 0x109   :  { %v215_v34 = vmul.f32 %v211_v23, %v185_v10  ;;  %v299_v48 = vmul.f32 %v286_v4, %v779_v40  ;;  %v302_v51 = vmul.f32 %v298_v8, %v779_v40  ;;  %v216_v0 = vmul.f32 %v212_v28, %v184_v5 }
 0x10a   :  { %v367_v4 = vrot.slane %v796_v53, %v706_v26  ;;  %v335_v23 = vrot.slane %v796_v53, %v703_v25 }
 0x10b   :  { %v222_v50 = vpop.permute.xlu1 %221  ;;  %v271_v57 = vpop.permute.xlu0 %270 }
 0x10c   :  { %v345_v28 = vmul.f32 %v335_v23, %v781_v41 }
 0x10f   :  { %v224_v52 = vpop.permute.xlu1 %223  ;;  %v839_v11 = vpop.permute.xlu0 %315 }
 0x110   :  { %v232_v1 = vsel %vm229_vm0, %v222_v50, %v224_v52 }
 0x111   :  { %v259_v22 = vmul.f32 %v255_v7, %v232_v1 }
 0x113   :  { %v226_v54 = vpop.permute.xlu1 %225  ;;  %v263_v59 = vadd.f32 %v259_v22, %v214_v32  ;;  %v331_v22 = vrot.slane %v742_v30, %v703_v25  ;;  %v343_v32 = vrot.slane %v804_v56, %v703_v25 }
 0x114   :  { %v231_v2 = vsel %vm229_vm0, %v224_v52, %v226_v54  ;;  %v257_v52 = vmul.f32 %v253_v15, %v737_v27  ;;  %v213_v27 = vmul.f32 %v209_v18, %v187_v37 }
 0x115   :  { %v260_v20 = vmul.f32 %v256_v21, %v231_v2 }
 0x117   :  { %v228_v61 = vpop.permute.xlu1 %227  ;;  %v264_v60 = vadd.f32 %v260_v20, %v215_v34  ;;  %v377_v20 = vmul.f32 %v367_v4, %v756_v35 }
 0x118   :  { %v230_v17 = vsel %vm229_vm0, %v226_v54, %v228_v61  ;;  %v233_v36 = vsel %vm229_vm0, %v228_v61, %v222_v50  ;;  %v865_v50 = vpop.permute.xlu0 %390 }
 0x119   :  { %v258_v61 = vmul.f32 %v254_v47, %v233_v36  ;;  %v261_v49 = vmul.f32 %v257_v52, %v230_v17  ;;  %v344_v47 = vmul.f32 %v331_v22, %v781_v41  ;;  %v381_v52 = vmul.f32 %v377_v20, %v735_v24 }
 0x11b   :  { %v267_v16 = vpop.permute.xlu1 %266  ;;  %v262_v21 = vadd.f32 %v258_v61, %v213_v27  ;;  %v265_v9 = vadd.f32 %v261_v49, %v216_v0 }
 0x11c   :  { %v875_v15 = vpop.permute.xlu0 %394 }
 0x11f   :  { %v269_v58 = vpop.permute.xlu1 %268 }
 0x120   :  { %v276_v12 = vsel %vm274_vm2, %v269_v58, %v271_v57  ;;  %v277_v54 = vsel %vm274_vm2, %v267_v16, %v269_v58  ;;  %v896_v17 = vpop.permute.xlu0 %435 }
 0x121   :  { %v304_v62 = vmul.f32 %v300_v29, %v277_v54  ;;  %v305_v63 = vmul.f32 %v301_v31, %v276_v12 }
 0x123   :  { %v308_v1 = vadd.f32 %v304_v62, %v263_v59  ;;  %v309_v2 = vadd.f32 %v305_v63, %v264_v60  ;;  %v273_v3 = vpop.permute.xlu1 %272 }
 0x124   :  { %v275_v6 = vsel %vm274_vm2, %v271_v57, %v273_v3  ;;  %v278_v7 = vsel %vm274_vm2, %v273_v3, %v267_v16  ;;  %v339_v57 = vrot.slane %v747_v19, %v703_v25  ;;  %v375_v16 = vrot.slane %v804_v56, %v706_v26  ;;  %v440_v63 = vpop.permute.xlu0 %439 }
 0x125   :  { %v303_v10 = vmul.f32 %v299_v48, %v278_v7  ;;  %v306_v14 = vmul.f32 %v302_v51, %v275_v6  ;;  %v347_v25 = vmul.f32 %v343_v32, %v781_v41  ;;  %v452_v3 = vsub.s32 6, %v683_v13 }
 0x126   :  { %v346_v29 = vmul.f32 %v339_v57, %v781_v41  ;;  %v379_v5 = vmul.f32 %v375_v16, %v756_v35 }
 0x127   :  { %v307_v40 = vadd.f32 %v303_v10, %v262_v21  ;;  %v310_v8 = vadd.f32 %v306_v14, %v265_v9  ;;  %v312_v18 = vpop.permute.xlu1 %311  ;;  %v590_v21 = vld [vmem:[%s1030_s4 + $0x20] ss:$0 sm:$0xff]  ;;  %v497_v9 = vsub.s32 7, %v683_v13  ;;  %v453_v14 = vrot.slane %v742_v30, %v452_v3 }
 0x128   :  { %v383_v24 = vmul.f32 %v379_v5, %v754_v33  ;;  %v465_v4 = vrot.slane %v804_v56, %v452_v3  ;;  %v934_v23 = vmul.f32 %v590_v21, %v785_v43  ;;  %v461_v20 = vrot.slane %v747_v19, %v452_v3 }
 0x12b   :  { %v314_v31 = vpop.permute.xlu1 %313 }
 0x12c   :  { %v321_v34 = vsel %vm319_vm3, %v314_v31, %v839_v11  ;;  %v322_v26 = vsel %vm319_vm3, %v312_v18, %v314_v31  ;;  %v498_v31 = vrot.slane %v742_v30, %v497_v9 }
 0x12d   :  { %v349_v36 = vmul.f32 %v345_v28, %v322_v26  ;;  %v350_v37 = vmul.f32 %v346_v29, %v321_v34  ;;  %v466_v34 = vmul.f32 %v453_v14, %v787_v44  ;;  %v469_v26 = vmul.f32 %v465_v4, %v787_v44 }
 0x12f   :  { %v353_v58 = vadd.f32 %v349_v36, %v308_v1  ;;  %v354_v59 = vadd.f32 %v350_v37, %v309_v2  ;;  %v318_v60 = vpop.permute.xlu1 %317  ;;  %v407_v1 = vsub.s32 5, %v683_v13  ;;  %v481_v2 = vpop.permute.xlu0 %480  ;;  %v502_v36 = vrot.slane %v796_v53, %v497_v9 }
 0x130   :  { %v320_v12 = vsel %vm319_vm3, %v839_v11, %v318_v60  ;;  %v323_v54 = vsel %vm319_vm3, %v318_v60, %v312_v18  ;;  %v506_v60 = vrot.slane %v747_v19, %v497_v9 }
 0x131   :  { %v348_v61 = vmul.f32 %v344_v47, %v323_v54  ;;  %v351_v49 = vmul.f32 %v347_v25, %v320_v12  ;;  %v907_v62 = vadd.f32 %v381_v52, %v353_v58  ;;  %v910_v35 = vadd.f32 %v763_v39, %v354_v59 }
 0x132   :  { %v408_v39 = vrot.slane %v742_v30, %v407_v1  ;;  %v420_v7 = vrot.slane %v804_v56, %v407_v1  ;;  %v412_v33 = vrot.slane %v796_v53, %v407_v1  ;;  %v416_v10 = vrot.slane %v747_v19, %v407_v1 }
 0x133   :  { %v352_v48 = vadd.f32 %v348_v61, %v307_v40  ;;  %v355_v41 = vadd.f32 %v351_v49, %v310_v8  ;;  %v389_v51 = vpop.permute.xlu1 %388  ;;  %v485_v40 = vpop.permute.xlu0 %484  ;;  %v457_v8 = vrot.slane %v796_v53, %v452_v3  ;;  %v468_v59 = vmul.f32 %v461_v20, %v787_v44 }
 0x134   :  { %v421_v13 = vmul.f32 %v408_v39, %v783_v42  ;;  %v424_v16 = vmul.f32 %v420_v7, %v783_v42  ;;  %v422_v22 = vmul.f32 %v412_v33, %v783_v42  ;;  %v399_v28 = vsel %vm396_vm4, %v389_v51, %v865_v50 }
 0x135   :  { %v384_v27 = vadd.f32 %v761_v38, %v352_v48  ;;  %v914_v0 = vadd.f32 %v383_v24, %v355_v41  ;;  %v591_v38 = vld [vmem:[%s1030_s4 + $0x28] ss:$0 sm:$0xff]  ;;  %v423_v32 = vmul.f32 %v416_v10, %v783_v42  ;;  %v400_v37 = vsel %vm396_vm4, %v875_v15, %v389_v51 }
 0x136   :  { %v937_v57 = vmul.f32 %v591_v38, %v785_v43  ;;  %v467_v5 = vmul.f32 %v457_v8, %v787_v44  ;;  %v425_v42 = vmul.f32 %v421_v13, %v399_v28  ;;  %v511_v25 = vmul.f32 %v498_v31, %v791_v46 }
 0x137   :  { %v393_v11 = vpop.permute.xlu1 %392  ;;  %v524_v58 = vpop.permute.xlu0 %523  ;;  %v428_v12 = vmul.f32 %v424_v16, %v400_v37  ;;  %v512_v49 = vmul.f32 %v502_v36, %v791_v46 }
 0x138   :  { %v398_v29 = vsel %vm396_vm4, %v865_v50, %v393_v11  ;;  %v397_v50 = vsel %vm396_vm4, %v393_v11, %v875_v15  ;;  %v510_v15 = vrot.slane %v804_v56, %v497_v9  ;;  %v429_v41 = vadd.f32 %v425_v42, %v384_v27 }
 0x139   :  { %v426_v47 = vmul.f32 %v422_v22, %v398_v29  ;;  %v427_v54 = vmul.f32 %v423_v32, %v397_v50  ;;  %v513_v27 = vmul.f32 %v506_v60, %v791_v46  ;;  %v432_v33 = vadd.f32 %v428_v12, %v914_v0  ;;  %v593_v0 = vld [vmem:[%s1030_s4 + $0x38] ss:$0 sm:$0xff] }
 0x13a   :  { %v514_v7 = vmul.f32 %v510_v15, %v791_v46  ;;  %v592_v46 = vld [vmem:[%s1030_s4 + $0x30] ss:$0 sm:$0xff]  ;;  %v559_v31 = vmul.f32 %v593_v0, %v785_v43 }
 0x13b   :  { %v434_v6 = vpop.permute.xlu1 %433  ;;  %v430_v51 = vadd.f32 %v426_v47, %v907_v62  ;;  %v528_v62 = vpop.permute.xlu0 %527  ;;  %v558_v29 = vmul.f32 %v592_v46, %v785_v43 }
 0x13c   :  { %v444_v52 = vsel %vm441_vm5, %v434_v6, %v896_v17  ;;  %v445_v24 = vsel %vm441_vm5, %v440_v63, %v434_v6 }
 0x13d   :  { %v473_v39 = vmul.f32 %v469_v26, %v445_v24 }
 0x13f   :  { %v438_v18 = vpop.permute.xlu1 %437  ;;  %v477_v16 = vadd.f32 %v473_v39, %v432_v33 }
 0x140   :  { %v443_v53 = vsel %vm441_vm5, %v896_v17, %v438_v18  ;;  %v470_v17 = vmul.f32 %v466_v34, %v444_v52  ;;  %v442_v44 = vsel %vm441_vm5, %v438_v18, %v440_v63 }
 0x141   :  { %v471_v48 = vmul.f32 %v467_v5, %v443_v53  ;;  %v472_v63 = vmul.f32 %v468_v59, %v442_v44 }
 0x142   :  { %v474_v21 = vadd.f32 %v470_v17, %v429_v41 }
 0x143   :  { %v479_v30 = vpop.permute.xlu1 %478  ;;  %v475_v38 = vadd.f32 %v471_v48, %v430_v51 }
 0x144   :  { %v489_v61 = vsel %vm486_vm6, %v479_v30, %v481_v2  ;;  %v490_v11 = vsel %vm486_vm6, %v485_v40, %v479_v30 }
 0x145   :  { %v515_v1 = vmul.f32 %v511_v25, %v489_v61  ;;  %v518_v10 = vmul.f32 %v514_v7, %v490_v11 }
 0x147   :  { %v483_v56 = vpop.permute.xlu1 %482  ;;  %v522_v34 = vadd.f32 %v518_v10, %v477_v16 }
 0x148   :  { %v488_v19 = vsel %vm486_vm6, %v481_v2, %v483_v56  ;;  %v487_v3 = vsel %vm486_vm6, %v483_v56, %v485_v40  ;;  %v431_v2 = vadd.f32 %v427_v54, %v910_v35  ;;  %v519_v35 = vadd.f32 %v515_v1, %v474_v21 }
 0x149   :  { %v516_v6 = vmul.f32 %v512_v49, %v488_v19  ;;  %v517_v14 = vmul.f32 %v513_v27, %v487_v3 }
 0x14a   :  { %v476_v22 = vadd.f32 %v472_v63, %v431_v2 }
 0x14b   :  { %v526_v9 = vpop.permute.xlu1 %525  ;;  %v520_v8 = vadd.f32 %v516_v6, %v475_v38 }
 0x14c   :  { %v533_v4 = vsel %vm531_vm7, %v526_v9, %v528_v62  ;;  %v534_v40 = vsel %vm531_vm7, %v524_v58, %v526_v9  ;;  %v521_v26 = vadd.f32 %v517_v14, %v476_v22 }
 0x14d   :  { %v560_v18 = vmul.f32 %v934_v23, %v534_v40  ;;  %v561_v13 = vmul.f32 %v937_v57, %v533_v4 }
 0x14f   :  { %v564_v20 = vadd.f32 %v560_v18, %v519_v35  ;;  %v565_v28 = vadd.f32 %v561_v13, %v520_v8  ;;  %v530_v32 = vpop.permute.xlu1 %529 }
 0x150   :  { %v532_v36 = vsel %vm531_vm7, %v528_v62, %v530_v32  ;;  %v535_v37 = vsel %vm531_vm7, %v530_v32, %v524_v58 }
 0x151   :  { %v574_v23 = vadd.f32 %v789_v45, %v564_v20  ;;  %v575_v57 = vadd.f32 %v789_v45, %v565_v28  ;;  %v562_v50 = vmul.f32 %v558_v29, %v532_v36  ;;  %v563_v5 = vmul.f32 %v559_v31, %v535_v37 }
 0x153   :  { %v578_v30 = vmax.f32 %v574_v23, 0.0  ;;  %v579_v42 = vmax.f32 %v575_v57, 0.0  ;;  %v566_v47 = vadd.f32 %v562_v50, %v521_v26  ;;  %v567_v52 = vadd.f32 %v563_v5, %v522_v34 }
 0x155   :  { %582 = vst [vmem:[%s1031_s5] sm:$0xff] %v578_v30  ;;  %583 = vst [vmem:[%s1031_s5 + $0x8] sm:$0xff] %v579_v42  ;;  %v576_v43 = vadd.f32 %v789_v45, %v566_v47  ;;  %v577_v55 = vadd.f32 %v789_v45, %v567_v52 }
 0x157   :  { %v580_v53 = vmax.f32 %v576_v43, 0.0  ;;  %v581_v58 = vmax.f32 %v577_v55, 0.0 }
 0x159   :  { %584 = vst [vmem:[%s1031_s5 + $0x10] sm:$0xff] %v580_v53  ;;  %585 = vst [vmem:[%s1031_s5 + $0x18] sm:$0xff] %v581_v58 }

</bundles_post_ra>
